<compile_context>
chip_gen: v7x
topology: tpu7x:2x2x1
jax: 0.10.0
libtpu: 0.0.40
codegen_flags: <defaults>
</compile_context>

<pallas_src>
import functools
import math

import jax
import jax.numpy as jnp
from jax.experimental import pallas as pl
from jax.experimental.pallas import tpu as pltpu


# ----------------------------------------------------------------------------
# Pallas kernel
# ----------------------------------------------------------------------------
def _make_warp_kernel(C, H, W, HW, PT, KT, n_k):
    # align_corners=True unnormalization exactly cancels the module's
    # normalization when W>1 / H>1; the general factor handles W==1 / H==1.
    sx = float(W - 1) / float(max(W - 1, 1))
    sy = float(H - 1) / float(max(H - 1, 1))
    inv_w = 1.0 / float(W)
    rows_per_k = KT // W

    def kernel(x_ref, flo_ref, o_ref, acc_ref):
        # x_ref:   (1, C, HW)  full image, VMEM-resident per batch step
        # flo_ref: (1, 2, PT)  flow for this output pixel tile
        # o_ref:   (1, C, PT)  output pixel tile
        # acc_ref: (C, PT)     f32 accumulator over the K (source-pixel) axis
        t = pl.program_id(1)
        k = pl.program_id(2)

        @pl.when(k == 0)
        def _():
            acc_ref[...] = jnp.zeros_like(acc_ref)

        # ---- output pixel coordinates for this tile: (1, PT) int32 --------
        p_i = jax.lax.broadcasted_iota(jnp.int32, (1, PT), 1) + t * PT
        # h = p // W, w = p % W via float estimate + exact integer correction
        # (no vector integer division; exact for any realistic image size).
        p_f = p_i.astype(jnp.float32)
        h_est = jnp.floor(p_f * inv_w).astype(jnp.int32)
        w_est = p_i - h_est * W
        h_i = jnp.where(w_est >= W, h_est + 1,
                        jnp.where(w_est < 0, h_est - 1, h_est))
        w_i = p_i - h_i * W
        h_f = h_i.astype(jnp.float32)
        w_f = w_i.astype(jnp.float32)

        flo = flo_ref[0]                           # (2, PT)
        fx = flo[0:1, :]                           # (1, PT)
        fy = flo[1:2, :]                           # (1, PT)

        # Source sampling coordinates in pixel space.
        ix = (w_f + fx) * sx
        iy = (h_f + fy) * sy

        x0f = jnp.floor(ix)
        y0f = jnp.floor(iy)
        wx1 = ix - x0f
        wx0 = 1.0 - wx1
        wy1 = iy - y0f
        wy0 = 1.0 - wy1

        # In-bounds gates per 1-D tap (zero-padding). Bilinear corner validity
        # factorizes: valid(x_tap, y_tap) = valid_x * valid_y.  Gating also
        # protects against implementation-defined int casts of far-OOB / NaN
        # coordinates (the matching weight is forced to zero).
        vx0 = (x0f >= 0.0) & (x0f <= float(W - 1))
        vx1 = (x0f >= -1.0) & (x0f <= float(W - 2))      # x1 = x0 + 1 in range
        vy0 = (y0f >= 0.0) & (y0f <= float(H - 1))
        vy1 = (y0f >= -1.0) & (y0f <= float(H - 2))      # y1 = y0 + 1 in range
        wx0e = jnp.where(vx0, wx0, 0.0)
        wx1e = jnp.where(vx1, wx1, 0.0)
        wy0e = jnp.where(vy0, wy0, 0.0)
        wy1e = jnp.where(vy1, wy1, 0.0)

        x0i = x0f.astype(jnp.int32)
        x1i = x0i + 1
        y0i = y0f.astype(jnp.int32)
        y1i = y0i + 1

        # ---- separable tap matrices (the cheap replacement for 4 one-hot
        # (HW, PT) slabs):  Ax (W, PT), Ay (rows_per_k, PT) -----------------
        xw = jax.lax.broadcasted_iota(jnp.int32, (W, PT), 0)
        Ax = (jnp.where(xw == x0i, wx0e, 0.0) +
              jnp.where(xw == x1i, wx1e, 0.0))
        yh = (jax.lax.broadcasted_iota(jnp.int32, (rows_per_k, PT), 0)
              + k * rows_per_k)
        Ay = (jnp.where(yh == y0i, wy0e, 0.0) +
              jnp.where(yh == y1i, wy1e, 0.0))

        # One full-size multiply: outer product -> (KT, PT) scatter block.
        # (W is typically a multiple of 8 so the reshape is layout-preserving.)
        tmat = (Ay[:, None, :] * Ax[None, :, :]).reshape(KT, PT)

        # Gather-as-matmul on the MXU: (C, KT) @ (KT, PT) -> (C, PT).
        if n_k == 1:
            x_blk = x_ref[0]                                    # (C, HW==KT)
        else:
            start = pl.multiple_of(k * KT, KT)
            x_blk = x_ref[0, :, pl.ds(start, KT)]               # (C, KT)
        acc_ref[...] += jnp.dot(x_blk, tmat,
                                preferred_element_type=jnp.float32)

        @pl.when(k == n_k - 1)
        def _():
            # mask = grid_sample(ones) = sum of in-bounds corner weights,
            # which factorizes; binarize exactly like the PyTorch code.
            mask_val = (wx0e + wx1e) * (wy0e + wy1e)            # (1, PT)
            mask = jnp.where(mask_val < 0.9999, 0.0, 1.0)
            o_ref[0] = (acc_ref[...] * mask).astype(o_ref.dtype)

    return kernel


def _choose_tiles(H, W):
    HW = H * W
    # Lane-dense output pixel tile (prefer 512 per the v6e note; multiple of
    # 128 so stores are unmasked), else the full extent.
    PT = HW
    for cand in (512, 256, 128):
        if HW % cand == 0:
            PT = cand
            break
    # K (source-pixel) tile = whole input rows, bounded so the (KT, PT) f32
    # tap slab stays ~<= 4 MiB (keeps the footprint safe on v7x's 64 MiB VMEM).
    tap_budget = 4 * 1024 * 1024
    rows_budget = max(1, (tap_budget // (PT * 4)) // W)
    rows_per_k = 1
    for r in range(1, H + 1):
        if H % r == 0 and r <= rows_budget:
            rows_per_k = r
    KT = rows_per_k * W
    n_k = H // rows_per_k
    return PT, KT, n_k


@functools.lru_cache(maxsize=None)
def _build_warp(B, C, H, W, PT, KT, n_k):
    HW = H * W
    n_tiles = HW // PT
    kernel = _make_warp_kernel(C, H, W, HW, PT, KT, n_k)

    # Explicit VMEM budget from the actual block sizes (generous margin).
    est = (2 * C * HW * 4            # image block (double-buffered)
           + 2 * 2 * PT * 4          # flow tile
           + 2 * C * PT * 4          # output tile
           + C * PT * 4              # accumulator scratch
           + 3 * KT * PT * 4         # tap slab + intermediates
           + (W + KT // W) * PT * 4  # Ax / Ay
           + (1 << 20))
    vmem_limit = int(min(96 * 1024 * 1024, max(32 * 1024 * 1024, 2 * est)))

    cost = pl.CostEstimate(
        flops=int(2 * B * (C + 4) * HW * HW),
        transcendentals=0,
        bytes_accessed=int(4 * B * (2 * C * HW + 2 * HW)),
    )

    f = pl.pallas_call(
        kernel,
        out_shape=jax.ShapeDtypeStruct((B, C, HW), jnp.float32),
        grid_spec=pltpu.PrefetchScalarGridSpec(
            num_scalar_prefetch=0,
            grid=(B, n_tiles, n_k),
            in_specs=[
                # Full image, resident per batch step (ignores t and k).
                pl.BlockSpec((1, C, HW), lambda b, t, k: (b, 0, 0)),
                # Flow tile for this output pixel tile (constant across k).
                pl.BlockSpec((1, 2, PT), lambda b, t, k: (b, 0, t)),
            ],
            out_specs=pl.BlockSpec((1, C, PT), lambda b, t, k: (b, 0, t)),
            scratch_shapes=[pltpu.VMEM((C, PT), jnp.float32)],
        ),
        compiler_params=pltpu.CompilerParams(
            # b: megacore-shardable; t: NOT core-split (keeps the resident
            # image from being re-fetched from HBM); k: reduction axis.
            dimension_semantics=("parallel", "arbitrary", "arbitrary"),
            vmem_limit_bytes=vmem_limit,
        ),
        cost_estimate=cost,
    )
    return jax.jit(f)


def warping_layer_forward(x_nchw, flo_nchw):
    """x: (B, C, H, W) image, flo: (B, 2, H, W) flow. Returns warped (B, C, H, W)."""
    B, C, H, W = x_nchw.shape
    assert flo_nchw.shape == (B, 2, H, W), flo_nchw.shape
    HW = H * W

    PT, KT, n_k = _choose_tiles(H, W)

    x_flat = x_nchw.reshape(B, C, HW).astype(jnp.float32)
    flo_flat = flo_nchw.reshape(B, 2, HW).astype(jnp.float32)

    out = _build_warp(B, C, H, W, PT, KT, n_k)(x_flat, flo_flat)
    return out.reshape(B, C, H, W)


# ----------------------------------------------------------------------------
# Pure-JAX reference (grid_sample bilinear, zeros padding, align_corners=True)
# used only for the numerical check in __main__.
# ----------------------------------------------------------------------------
def _warp_ref(x, flo):
    B, C, H, W = x.shape
    xx = jnp.arange(W, dtype=jnp.float32)[None, None, :]
    yy = jnp.arange(H, dtype=jnp.float32)[None, :, None]
    sx = float(W - 1) / float(max(W - 1, 1))
    sy = float(H - 1) / float(max(H - 1, 1))
    ix = (xx + flo[:, 0]) * sx
    iy = (yy + flo[:, 1]) * sy
    x0 = jnp.floor(ix)
    y0 = jnp.floor(iy)
    x1 = x0 + 1.0
    y1 = y0 + 1.0
    wx1 = ix - x0
    wx0 = 1.0 - wx1
    wy1 = iy - y0
    wy0 = 1.0 - wy1
    xf = x.reshape(B, C, H * W)

    def corner(xc, yc, w):
        valid = ((xc >= 0) & (xc <= W - 1) & (yc >= 0) & (yc <= H - 1))
        w_eff = jnp.where(valid, w, 0.0)
        xi = jnp.clip(xc, 0, W - 1).astype(jnp.int32)
        yi = jnp.clip(yc, 0, H - 1).astype(jnp.int32)
        flat = (yi * W + xi).reshape(B, 1, H * W)
        v = jnp.take_along_axis(xf, flat, axis=2).reshape(B, C, H, W)
        return v * w_eff[:, None], w_eff

    o00, m00 = corner(x0, y0, wy0 * wx0)
    o10, m10 = corner(x1, y0, wy0 * wx1)
    o01, m01 = corner(x0, y1, wy1 * wx0)
    o11, m11 = corner(x1, y1, wy1 * wx1)
    out = o00 + o10 + o01 + o11
    mask_val = m00 + m10 + m01 + m11
    mask = jnp.where(mask_val < 0.9999, 0.0, 1.0)[:, None]
    return out * mask


if __name__ == "__main__":
    key = jax.random.PRNGKey(0)
    kx, kf = jax.random.split(key)

    B, C, H, W = 2, 4, 16, 16
    x = jax.random.normal(kx, (B, C, H, W), jnp.float32)
    # Flow with a few-pixel magnitude so some samples land out of bounds
    # (exercises the zero-padding + mask path).
    flo = 2.5 * jax.random.normal(kf, (B, 2, H, W), jnp.float32)

    out = jax.block_until_ready(warping_layer_forward(x, flo))
    assert out.shape == (B, C, H, W), out.shape
    assert out.dtype == jnp.float32

    # Sanity 1: zero flow -> identity warp, mask all ones.
    out0 = jax.block_until_ready(
        warping_layer_forward(x, jnp.zeros((B, 2, H, W), jnp.float32)))
    assert jnp.allclose(out0, x, atol=1e-5), float(jnp.max(jnp.abs(out0 - x)))

    # Sanity 2: match a pure-JAX grid_sample reference.
    ref = jax.block_until_ready(_warp_ref(x, flo))
    assert jnp.allclose(out, ref, atol=1e-4, rtol=1e-4), \
        float(jnp.max(jnp.abs(out - ref)))

    print("KERNEL_OK")
</pallas_src>

<mosaic_0001>
module attributes {stable_mosaic.version = 11 : i64} {
  func.func @kernel(%arg0: i32, %arg1: i32, %arg2: i32, %arg3: memref<1x4x256xf32, #tpu.memory_space<vmem>>, %arg4: memref<1x2x256xf32, #tpu.memory_space<vmem>>, %arg5: memref<1x4x256xf32, #tpu.memory_space<vmem>>, %arg6: memref<4x256xf32, #tpu.memory_space<vmem>>) attributes {dimension_semantics = [#tpu.dimension_semantics<parallel>, #tpu.dimension_semantics<arbitrary>, #tpu.dimension_semantics<arbitrary>], iteration_bounds = array<i64: 2, 1, 1>, scalar_prefetch = 0 : i64, scratch_operands = 1 : i64, tpu.core_type = #tpu.core_type<tc>, window_params = [{transform_indices = @transform_0, window_bounds = array<i64: 1, 4, 256>}, {transform_indices = @transform_1, window_bounds = array<i64: 1, 2, 256>}, {transform_indices = @transform_2, window_bounds = array<i64: 1, 4, 256>}]} {
    %c0_i32 = arith.constant 0 : i32
    %0 = arith.cmpi eq, %arg2, %c0_i32 : i32
    %1 = arith.extui %0 : i1 to i32
    %c0_i32_0 = arith.constant 0 : i32
    %2 = arith.cmpi ne, %1, %c0_i32_0 : i32
    scf.if %2 {
      %cst_40 = arith.constant 0.000000e+00 : f32
      %128 = vector.broadcast %cst_40 : f32 to vector<4x256xf32>
      %c0_41 = arith.constant 0 : index
      %c0_42 = arith.constant 0 : index
      %129 = vector.load %arg6[%c0_41, %c0_42] : memref<4x256xf32, #tpu.memory_space<vmem>>, vector<4x256xf32>
      tpu.vector_store %arg6[%c0_41, %c0_42], %128 {strides = array<i32>} : memref<4x256xf32, #tpu.memory_space<vmem>>, vector<4x256xf32>,
    } else {
    }
    %3 = tpu.iota {dimensions = array<i32: 1>} : vector<1x256xi32>
    %c256_i32 = arith.constant 256 : i32
    %4 = arith.muli %arg1, %c256_i32 : i32
    %5 = vector.broadcast %4 : i32 to vector<1x256xi32>
    %6 = arith.addi %3, %5 : vector<1x256xi32>
    %7 = arith.sitofp %6 : vector<1x256xi32> to vector<1x256xf32>
    %cst = arith.constant 6.250000e-02 : f32
    %8 = vector.broadcast %cst : f32 to vector<1x256xf32>
    %9 = arith.mulf %7, %8 : vector<1x256xf32>
    %10 = math.floor %9 : vector<1x256xf32>
    %11 = arith.fptosi %10 : vector<1x256xf32> to vector<1x256xi32>
    %c16_i32 = arith.constant 16 : i32
    %12 = vector.broadcast %c16_i32 : i32 to vector<1x256xi32>
    %13 = arith.muli %11, %12 : vector<1x256xi32>
    %14 = arith.subi %6, %13 : vector<1x256xi32>
    %c16_i32_1 = arith.constant 16 : i32
    %15 = vector.broadcast %c16_i32_1 : i32 to vector<1x256xi32>
    %16 = arith.cmpi sge, %14, %15 : vector<1x256xi32>
    %c1_i32 = arith.constant 1 : i32
    %17 = vector.broadcast %c1_i32 : i32 to vector<1x256xi32>
    %18 = arith.addi %11, %17 : vector<1x256xi32>
    %c0_i32_2 = arith.constant 0 : i32
    %19 = vector.broadcast %c0_i32_2 : i32 to vector<1x256xi32>
    %20 = arith.cmpi slt, %14, %19 : vector<1x256xi32>
    %c1_i32_3 = arith.constant 1 : i32
    %21 = vector.broadcast %c1_i32_3 : i32 to vector<1x256xi32>
    %22 = arith.subi %11, %21 : vector<1x256xi32>
    %23 = arith.select %20, %22, %11 : vector<1x256xi1>, vector<1x256xi32>
    %24 = arith.select %16, %18, %23 : vector<1x256xi1>, vector<1x256xi32>
    %c16_i32_4 = arith.constant 16 : i32
    %25 = vector.broadcast %c16_i32_4 : i32 to vector<1x256xi32>
    %26 = arith.muli %24, %25 : vector<1x256xi32>
    %27 = arith.subi %6, %26 : vector<1x256xi32>
    %28 = arith.sitofp %24 : vector<1x256xi32> to vector<1x256xf32>
    %29 = arith.sitofp %27 : vector<1x256xi32> to vector<1x256xf32>
    %c0 = arith.constant 0 : index
    %c0_5 = arith.constant 0 : index
    %c0_6 = arith.constant 0 : index
    %30 = vector.load %arg4[%c0, %c0_5, %c0_6] : memref<1x2x256xf32, #tpu.memory_space<vmem>>, vector<1x2x256xf32>
    %31 = vector.shape_cast %30 : vector<1x2x256xf32> to vector<2x256xf32>
    %32 = vector.extract_strided_slice %31 {offsets = [0, 0], sizes = [1, 256], strides = [1, 1]} : vector<2x256xf32> to vector<1x256xf32>
    %33 = vector.extract_strided_slice %31 {offsets = [1, 0], sizes = [1, 256], strides = [1, 1]} : vector<2x256xf32> to vector<1x256xf32>
    %34 = arith.addf %29, %32 : vector<1x256xf32>
    %cst_7 = arith.constant 1.000000e+00 : f32
    %35 = vector.broadcast %cst_7 : f32 to vector<1x256xf32>
    %36 = arith.mulf %34, %35 : vector<1x256xf32>
    %37 = arith.addf %28, %33 : vector<1x256xf32>
    %cst_8 = arith.constant 1.000000e+00 : f32
    %38 = vector.broadcast %cst_8 : f32 to vector<1x256xf32>
    %39 = arith.mulf %37, %38 : vector<1x256xf32>
    %40 = math.floor %36 : vector<1x256xf32>
    %41 = math.floor %39 : vector<1x256xf32>
    %42 = arith.subf %36, %40 : vector<1x256xf32>
    %cst_9 = arith.constant 1.000000e+00 : f32
    %43 = vector.broadcast %cst_9 : f32 to vector<1x256xf32>
    %44 = arith.subf %43, %42 : vector<1x256xf32>
    %45 = arith.subf %39, %41 : vector<1x256xf32>
    %cst_10 = arith.constant 1.000000e+00 : f32
    %46 = vector.broadcast %cst_10 : f32 to vector<1x256xf32>
    %47 = arith.subf %46, %45 : vector<1x256xf32>
    %cst_11 = arith.constant 0.000000e+00 : f32
    %48 = vector.broadcast %cst_11 : f32 to vector<1x256xf32>
    %49 = arith.cmpf oge, %40, %48 : vector<1x256xf32>
    %cst_12 = arith.constant 1.500000e+01 : f32
    %50 = vector.broadcast %cst_12 : f32 to vector<1x256xf32>
    %51 = arith.cmpf ole, %40, %50 : vector<1x256xf32>
    %52 = arith.andi %49, %51 : vector<1x256xi1>
    %cst_13 = arith.constant -1.000000e+00 : f32
    %53 = vector.broadcast %cst_13 : f32 to vector<1x256xf32>
    %54 = arith.cmpf oge, %40, %53 : vector<1x256xf32>
    %cst_14 = arith.constant 1.400000e+01 : f32
    %55 = vector.broadcast %cst_14 : f32 to vector<1x256xf32>
    %56 = arith.cmpf ole, %40, %55 : vector<1x256xf32>
    %57 = arith.andi %54, %56 : vector<1x256xi1>
    %cst_15 = arith.constant 0.000000e+00 : f32
    %58 = vector.broadcast %cst_15 : f32 to vector<1x256xf32>
    %59 = arith.cmpf oge, %41, %58 : vector<1x256xf32>
    %cst_16 = arith.constant 1.500000e+01 : f32
    %60 = vector.broadcast %cst_16 : f32 to vector<1x256xf32>
    %61 = arith.cmpf ole, %41, %60 : vector<1x256xf32>
    %62 = arith.andi %59, %61 : vector<1x256xi1>
    %cst_17 = arith.constant -1.000000e+00 : f32
    %63 = vector.broadcast %cst_17 : f32 to vector<1x256xf32>
    %64 = arith.cmpf oge, %41, %63 : vector<1x256xf32>
    %cst_18 = arith.constant 1.400000e+01 : f32
    %65 = vector.broadcast %cst_18 : f32 to vector<1x256xf32>
    %66 = arith.cmpf ole, %41, %65 : vector<1x256xf32>
    %67 = arith.andi %64, %66 : vector<1x256xi1>
    %cst_19 = arith.constant 0.000000e+00 : f32
    %68 = vector.broadcast %cst_19 : f32 to vector<1x256xf32>
    %69 = arith.select %52, %44, %68 : vector<1x256xi1>, vector<1x256xf32>
    %cst_20 = arith.constant 0.000000e+00 : f32
    %70 = vector.broadcast %cst_20 : f32 to vector<1x256xf32>
    %71 = arith.select %57, %42, %70 : vector<1x256xi1>, vector<1x256xf32>
    %cst_21 = arith.constant 0.000000e+00 : f32
    %72 = vector.broadcast %cst_21 : f32 to vector<1x256xf32>
    %73 = arith.select %62, %47, %72 : vector<1x256xi1>, vector<1x256xf32>
    %cst_22 = arith.constant 0.000000e+00 : f32
    %74 = vector.broadcast %cst_22 : f32 to vector<1x256xf32>
    %75 = arith.select %67, %45, %74 : vector<1x256xi1>, vector<1x256xf32>
    %76 = arith.fptosi %40 : vector<1x256xf32> to vector<1x256xi32>
    %c1_i32_23 = arith.constant 1 : i32
    %77 = vector.broadcast %c1_i32_23 : i32 to vector<1x256xi32>
    %78 = arith.addi %76, %77 : vector<1x256xi32>
    %79 = arith.fptosi %41 : vector<1x256xf32> to vector<1x256xi32>
    %c1_i32_24 = arith.constant 1 : i32
    %80 = vector.broadcast %c1_i32_24 : i32 to vector<1x256xi32>
    %81 = arith.addi %79, %80 : vector<1x256xi32>
    %82 = tpu.iota {dimensions = array<i32: 0>} : vector<16x256xi32>
    %83 = vector.broadcast %76 : vector<1x256xi32> to vector<16x256xi32>
    %84 = arith.cmpi eq, %82, %83 : vector<16x256xi32>
    %cst_25 = arith.constant 0.000000e+00 : f32
    %85 = vector.shape_cast %69 : vector<1x256xf32> to vector<1x256xf32>
    %86 = vector.broadcast %85 : vector<1x256xf32> to vector<16x256xf32>
    %87 = vector.broadcast %cst_25 : f32 to vector<16x256xf32>
    %88 = arith.select %84, %86, %87 : vector<16x256xi1>, vector<16x256xf32>
    %89 = vector.broadcast %78 : vector<1x256xi32> to vector<16x256xi32>
    %90 = arith.cmpi eq, %82, %89 : vector<16x256xi32>
    %cst_26 = arith.constant 0.000000e+00 : f32
    %91 = vector.shape_cast %71 : vector<1x256xf32> to vector<1x256xf32>
    %92 = vector.broadcast %91 : vector<1x256xf32> to vector<16x256xf32>
    %93 = vector.broadcast %cst_26 : f32 to vector<16x256xf32>
    %94 = arith.select %90, %92, %93 : vector<16x256xi1>, vector<16x256xf32>
    %95 = arith.addf %88, %94 : vector<16x256xf32>
    %96 = tpu.iota {dimensions = array<i32: 0>} : vector<16x256xi32>
    %c16_i32_27 = arith.constant 16 : i32
    %97 = arith.muli %arg2, %c16_i32_27 : i32
    %98 = vector.broadcast %97 : i32 to vector<16x256xi32>
    %99 = arith.addi %96, %98 : vector<16x256xi32>
    %100 = vector.broadcast %79 : vector<1x256xi32> to vector<16x256xi32>
    %101 = arith.cmpi eq, %99, %100 : vector<16x256xi32>
    %cst_28 = arith.constant 0.000000e+00 : f32
    %102 = vector.shape_cast %73 : vector<1x256xf32> to vector<1x256xf32>
    %103 = vector.broadcast %102 : vector<1x256xf32> to vector<16x256xf32>
    %104 = vector.broadcast %cst_28 : f32 to vector<16x256xf32>
    %105 = arith.select %101, %103, %104 : vector<16x256xi1>, vector<16x256xf32>
    %106 = vector.broadcast %81 : vector<1x256xi32> to vector<16x256xi32>
    %107 = arith.cmpi eq, %99, %106 : vector<16x256xi32>
    %cst_29 = arith.constant 0.000000e+00 : f32
    %108 = vector.shape_cast %75 : vector<1x256xf32> to vector<1x256xf32>
    %109 = vector.broadcast %108 : vector<1x256xf32> to vector<16x256xf32>
    %110 = vector.broadcast %cst_29 : f32 to vector<16x256xf32>
    %111 = arith.select %107, %109, %110 : vector<16x256xi1>, vector<16x256xf32>
    %112 = arith.addf %105, %111 : vector<16x256xf32>
    %113 = vector.shape_cast %112 : vector<16x256xf32> to vector<16x1x256xf32>
    %114 = vector.shape_cast %95 : vector<16x256xf32> to vector<1x16x256xf32>
    %115 = vector.broadcast %113 : vector<16x1x256xf32> to vector<16x16x256xf32>
    %116 = vector.broadcast %114 : vector<1x16x256xf32> to vector<16x16x256xf32>
    %117 = arith.mulf %115, %116 : vector<16x16x256xf32>
    %118 = vector.shape_cast %117 : vector<16x16x256xf32> to vector<256x256xf32>
    %c0_30 = arith.constant 0 : index
    %c0_31 = arith.constant 0 : index
    %c0_32 = arith.constant 0 : index
    %119 = vector.load %arg3[%c0_30, %c0_31, %c0_32] : memref<1x4x256xf32, #tpu.memory_space<vmem>>, vector<1x4x256xf32>
    %120 = vector.shape_cast %119 : vector<1x4x256xf32> to vector<4x256xf32>
    %c0_33 = arith.constant 0 : index
    %c0_34 = arith.constant 0 : index
    %121 = vector.load %arg6[%c0_33, %c0_34] : memref<4x256xf32, #tpu.memory_space<vmem>>, vector<4x256xf32>
    %cst_35 = arith.constant dense<0.000000e+00> : vector<4x256xf32>
    %122 = tpu.matmul %120, %118, %cst_35 {dimension_numbers = #tpu.dot_dimension_numbers<[1], [0], [0], [1], [0, 0, 1, 1], [], []>} : vector<4x256xf32>, vector<256x256xf32>, vector<4x256xf32> -> vector<4x256xf32>
    %123 = arith.addf %121, %122 : vector<4x256xf32>
    %c0_36 = arith.constant 0 : index
    %c0_37 = arith.constant 0 : index
    %124 = vector.load %arg6[%c0_36, %c0_37] : memref<4x256xf32, #tpu.memory_space<vmem>>, vector<4x256xf32>
    tpu.vector_store %arg6[%c0_36, %c0_37], %123 {strides = array<i32>} : memref<4x256xf32, #tpu.memory_space<vmem>>, vector<4x256xf32>,
    %c0_i32_38 = arith.constant 0 : i32
    %125 = arith.cmpi eq, %arg2, %c0_i32_38 : i32
    %126 = arith.extui %125 : i1 to i32
    %c0_i32_39 = arith.constant 0 : i32
    %127 = arith.cmpi ne, %126, %c0_i32_39 : i32
    scf.if %127 {
      %128 = arith.addf %69, %71 : vector<1x256xf32>
      %129 = arith.addf %73, %75 : vector<1x256xf32>
      %130 = arith.mulf %128, %129 : vector<1x256xf32>
      %cst_40 = arith.constant 0.999899983 : f32
      %131 = vector.broadcast %cst_40 : f32 to vector<1x256xf32>
      %132 = arith.cmpf olt, %130, %131 : vector<1x256xf32>
      %cst_41 = arith.constant 0.000000e+00 : f32
      %cst_42 = arith.constant 1.000000e+00 : f32
      %133 = vector.broadcast %cst_41 : f32 to vector<1x256xf32>
      %134 = vector.broadcast %cst_42 : f32 to vector<1x256xf32>
      %135 = arith.select %132, %133, %134 : vector<1x256xi1>, vector<1x256xf32>
      %c0_43 = arith.constant 0 : index
      %c0_44 = arith.constant 0 : index
      %136 = vector.load %arg6[%c0_43, %c0_44] : memref<4x256xf32, #tpu.memory_space<vmem>>, vector<4x256xf32>
      %137 = vector.broadcast %135 : vector<1x256xf32> to vector<4x256xf32>
      %138 = arith.mulf %136, %137 : vector<4x256xf32>
      %c0_45 = arith.constant 0 : index
      %c0_46 = arith.constant 0 : index
      %c0_47 = arith.constant 0 : index
      %139 = vector.load %arg5[%c0_45, %c0_46, %c0_47] : memref<1x4x256xf32, #tpu.memory_space<vmem>>, vector<1x4x256xf32>
      %140 = vector.shape_cast %139 : vector<1x4x256xf32> to vector<4x256xf32>
      %141 = vector.shape_cast %138 : vector<4x256xf32> to vector<1x4x256xf32>
      tpu.vector_store %arg5[%c0_45, %c0_46, %c0_47], %141 {strides = array<i32>} : memref<1x4x256xf32, #tpu.memory_space<vmem>>, vector<1x4x256xf32>,
    } else {
    }
    return
  }
  func.func @transform_0(%arg0: i32, %arg1: i32, %arg2: i32) -> (i32, i32, i32) {
    %c0_i32 = arith.constant 0 : i32
    %c0_i32_0 = arith.constant 0 : i32
    %c0_i32_1 = arith.constant 0 : i32
    return %arg0, %c0_i32, %c0_i32_0 : i32, i32, i32
  }
  func.func @transform_1(%arg0: i32, %arg1: i32, %arg2: i32) -> (i32, i32, i32) {
    %c0_i32 = arith.constant 0 : i32
    %c0_i32_0 = arith.constant 0 : i32
    return %arg0, %c0_i32, %arg1 : i32, i32, i32
  }
  func.func @transform_2(%arg0: i32, %arg1: i32, %arg2: i32) -> (i32, i32, i32) {
    %c0_i32 = arith.constant 0 : i32
    %c0_i32_0 = arith.constant 0 : i32
    return %arg0, %c0_i32, %arg1 : i32, i32, i32
  }
}

</mosaic_0001>

<bundles_post_ra>
// kernel: tpu_custom_call.1
= control target key start
LH: loop header
LB: loop body
LE: loop exit
PB: predicated region body
PF: predicated region fallthrough
CT: control target
= control target key end

     0   :  { %7 = vsyncpa [#allocation4], 0  ;;  %s1837_s0 = inlined_call_operand.hbm [shape: f32[2,4,256], index: 0, kind: input, shape index: {}]   ;;  %s1838_s1 = inlined_call_operand.hbm [shape: f32[2,2,256], index: 1, kind: input, shape index: {}]   ;;  %s1839_s2 = inlined_call_operand.hbm [shape: f32[2,4,256], index: 2, kind: output, shape index: {}]  }
   0x1   :  { %9 = vsyncpa [#allocation4 + $0x1], 0 }
   0x2   :  { %10 = vsyncpa [#allocation7], 0 }
   0x3   :  { %12 = vsyncpa [#allocation7 + $0x1], 0 }
   0x4   :  { %13 = vsyncpa [#allocation5], 0 }
   0x5   :  { %15 = vsyncpa [#allocation5 + $0x1], 0  ;;  %s1361_s9 = smov 0   ;;  %s1363_s10 = smov 0  }
   0x6   :  { %s1365_s11 = smov 0   ;;  %s1367_s12 = smov 0  }
   0x7   :  { %s1369_s13 = smov 0   ;;  %s1371_s14 = smov 0  }
   0x8 LB: > { %s1023_s15 = sadd.s32 4294967295, %s1339_s14   ;;  %s1024_s16 = sadd.s32 4294967294, %s1339_s14   ;;  %s1339_s14 = sphi %s1371_s14, %s21_s14   ;;  %s1335_s13 = sphi %s1369_s13, %s1868_s13   ;;  %s1331_s12 = sphi %s1367_s12, %s1867_s12   ;;  %s1327_s11 = sphi %s1365_s11, %s1866_s11   ;;  %s1323_s10 = sphi %s1363_s10, %s1865_s10   ;;  %s1319_s9 = sphi %s1361_s9, %s1864_s9  }
   0x9   : > { %s40_s17 = sadd.s32 1, %s1335_s13  ;;  %s47_s18 = sadd.s32 1, %s1327_s11 }
   0xa   : > { %p42_p0 = scmp.ge.s32.totalorder %s40_s17, 2  ;;  %p54_p1 = scmp.ne.s32.totalorder %s1327_s11, %s1323_s10 }
   0xb   : > { %p55_p2 = scmp.eq.s32.totalorder %s1339_s14, 0  ;;  %p60_p3 = scmp.ne.s32.totalorder %s1323_s10, %s1319_s9 }
   0xc   : > { %s1870_s17 = smov (%p42_p0, %s40_s17), 0  ;;  %p61_p5 = scmp.eq.s32.totalorder %s1023_s15, 0 }
   0xd   : > { %p1402_p4 = por %p55_p2, %p54_p1  ;;  %s44_s20 = ssub.s32 %s1335_s13, %s1870_s17 }
   0xe   : > { %p114_p6 = scmp.eq.s32.totalorder %s1023_s15, 1  ;;  %p45_p7 = scmp.eq.s32.totalorder %s44_s20, 0 }
   0xf   : > { %p1408_p8 = por %p61_p5, %p60_p3  ;;  %p120_p10 = scmp.eq.s32.totalorder %s1024_s16, 1 }
  0x10   : > { %p1412_p9 = por %p114_p6, %p54_p1  ;;  %p1140_p13 = scmp.lt.s32.totalorder %s1339_s14, 2 }
  0x11   : > { %s1843_s21 = scalar_select %p1408_p8, 1, 0 }
  0x12   : > { %s1844_s22 = scalar_select %p1412_p9, 1, 0 }
  0x13   : > { %s1417_s23 = scalar_select %p45_p7, %s1327_s11, %s47_s18  }
  0x14   : > { %p1419_p11 = por %p120_p10, %p60_p3  ;;  %s1426_s25 = sand.u32 1, %s1327_s11  }
  0x15   : > { %s1027_s26 = sshll.u32 %s1426_s25, 3  ;;  %s1044_s27 = sshll.u32 %s1335_s13, 7 }
  0x16   : > { %s1845_s24 = scalar_select %p1419_p11, 1, 0 }
  0x17   : > { %s1433_s30 = scalar_lea.hbm %s1837_s0, %s1044_s27  ;;  %s144_s3 = scalar_lea.vmem [#allocation3], %s1027_s26 }
  0x18   : > { %s152_s4 = sshll.u32 %s144_s3, 4  ;;  %p1439_p0 = pnand %p1140_p13, %p1402_p4  ;;  %s1435_s4 = int_to_ptr.vmem [resolvable:$true] %s152_s4 }
  0x19   : > { %s141_s6 = scalar_lea.sflag [#allocation4], %s1426_s25  ;;  %s1193_s7 = scalar_lea.hbm %s1433_s30, 128 }
  0x1a   : > { %p1194_p3 = scmp.ne.s32.totalorder %s1433_s30, %s1193_s7  ;;  %p1195_p5 = pneg %p1439_p0 }
  0x1b   : > { %s1198_s16 = scalar_lea.hbm %s1837_s0, 256  ;;  %p1199_p4 = scmp.lt.u32.totalorder %s1433_s30, %s1837_s0 }
  0x1c   : > { %p1196_p6 = pnand %p1195_p5, %p1194_p3  ;;  %p1200_p10 = scmp.lt.u32.totalorder %s1198_s16, %s1193_s7 }
  0x1d   : > { %p1202_p12 = scmp.lt.u32.totalorder %s1193_s7, %s1433_s30 }
  0x1e   : > { %p1197_p7 = pneg %p1196_p6  ;;  %p1201_p13 = por %p1200_p10, %p1199_p4 }
  0x20   : > { %p1203_p1 = por %p1202_p12, %p1201_p13 }
  0x22   : > { %p1204_p2 = pnand %p1203_p1, %p1197_p7 }
  0x24   : > { %1207 = shalt.err (!%p1204_p2)
}
  0x25   : > { %s1208_s20 = scalar_lea.vmem %s1435_s4, 128  ;;  %s1341_s26 = smov [#allocation3]  }
  0x26   : > { %p1209_p3 = scmp.ne.s32.totalorder %s1435_s4, %s1208_s20  ;;  %s1213_s27 = sshll.u32 %s1341_s26, 4  ;;  %s1214_s27 = int_to_ptr.vmem [resolvable:$false] %s1213_s27 }
  0x27   : > { %s1215_s28 = scalar_lea.vmem %s1214_s27, 256  ;;  %p1216_p9 = scmp.lt.s32.totalorder %s1435_s4, %s1214_s27 }
  0x28   : > { %p1211_p6 = pnand %p1209_p3, %p1195_p5  ;;  %p1217_p4 = scmp.lt.s32.totalorder %s1215_s28, %s1208_s20 }
  0x2a   : > { %p1212_p11 = pneg %p1211_p6  ;;  %p1218_p10 = por %p1217_p4, %p1216_p9 }
  0x2c   : > { %p1219_p12 = pnand %p1218_p10, %p1212_p11 }
  0x2e   : > { %1222 = shalt.err (!%p1219_p12)
}
  0x2f   : > { %1132 = dma.hbm_to_vmem [thread:$0]  (!%p1439_p0), %s1433_s30, 128, %s1435_s4, %s141_s6  }
  0x30   : > { %p1847_p1 = scmp.lt.s32.totalorder %s1339_s14, 3  ;;  %p1848_p2 = scmp.ge.s32.totalorder %s1339_s14, 1 }
  0x31   : > { %s1030_s3 = sshll.u32 %s1426_s25, 2  ;;  %s1045_s7 = sshll.u32 %s1335_s13, 6 }
  0x32   : > { %p1475_p7 = pnand %p1848_p2, %p1847_p1  ;;  %s1484_s16 = scalar_lea.hbm %s1838_s1, %s1045_s7 }
  0x33   : > { %s163_s18 = scalar_lea.vmem [#allocation6], %s1030_s3  ;;  %s160_s30 = scalar_lea.sflag [#allocation7], %s1426_s25 }
  0x34   : > { %s1849_s29 = scalar_select %p1475_p7, 1, 0 }
  0x35   : > { %s173_s19 = sshll.u32 %s163_s18, 4  ;;  %s1223_s4 = scalar_lea.hbm %s1484_s16, 64  ;;  %s174_s19 = int_to_ptr.vmem [resolvable:$true] %s173_s19 }
  0x36   : > { %p1224_p9 = scmp.ne.s32.totalorder %s1484_s16, %s1223_s4  ;;  %s1228_s26 = scalar_lea.hbm %s1838_s1, 128 }
  0x37   : > { %p1229_p3 = scmp.lt.u32.totalorder %s1484_s16, %s1838_s1  ;;  %p1230_p6 = scmp.lt.u32.totalorder %s1228_s26, %s1223_s4 }
  0x38   : > { %p1226_p11 = pnand %p1224_p9, %p1195_p5  ;;  %p1232_p10 = scmp.lt.u32.totalorder %s1223_s4, %s1484_s16 }
  0x39   : > { %p1231_p4 = por %p1230_p6, %p1229_p3 }
  0x3a   : > { %p1227_p13 = pneg %p1226_p11 }
  0x3b   : > { %p1233_p12 = por %p1232_p10, %p1231_p4 }
  0x3d   : > { %p1234_p1 = pnand %p1233_p12, %p1227_p13 }
  0x3f   : > { %1237 = shalt.err (!%p1234_p1)
}
  0x40   : > { %s1238_s25 = scalar_lea.vmem %s174_s19, 64  ;;  %s1342_s3 = smov [#allocation6]  }
  0x41   : > { %p1239_p2 = scmp.ne.s32.totalorder %s174_s19, %s1238_s25  ;;  %s1243_s7 = sshll.u32 %s1342_s3, 4  ;;  %s1244_s7 = int_to_ptr.vmem [resolvable:$false] %s1243_s7 }
  0x42   : > { %s1245_s8 = scalar_lea.vmem %s1244_s7, 128  ;;  %p1246_p8 = scmp.lt.s32.totalorder %s174_s19, %s1244_s7 }
  0x43   : > { %p1241_p9 = pnand %p1239_p2, %p1195_p5  ;;  %p1247_p7 = scmp.lt.s32.totalorder %s1245_s8, %s1238_s25 }
  0x45   : > { %p1242_p11 = pneg %p1241_p9  ;;  %p1248_p3 = por %p1247_p7, %p1246_p8 }
  0x47   : > { %p1249_p6 = pnand %p1248_p3, %p1242_p11 }
  0x49   : > { %1252 = shalt.err (!%p1249_p6)
}
  0x4a   : > { %1135 = dma.hbm_to_vmem [thread:$0]  (!%p1439_p0), %s1484_s16, 64, %s174_s19, %s160_s30  }
  0x4b   : > { %p1850_p13 = scmp.ne.s32.totalorder %s1849_s29, 0 }
  0x4c   : > { %s1509_s15 = sand.u32 (!%p1850_p13), 1, %s1323_s10   ;;  %p1851_p8 = scmp.ne.s32.totalorder (!%p1850_p13), %s1843_s21, 0 }
  0x4d   : > { %182 = sbr.rel (%p1850_p13) target bundleno = 445 (0x1bd), region = 28  ;;  %s1034_s18 = sshll.u32 (!%p1850_p13), %s1509_s15, 3 }
  0x4e   : > { %s185_s4 = scalar_lea.sflag (!%p1850_p13), [#allocation4], %s1509_s15  ;;  %s188_s6 = scalar_lea.vmem (!%p1850_p13), [#allocation3], %s1034_s18 }
  0x54   : > { %1306 = dma.done.wait (%p1851_p8), %s185_s4, 128  }
  0x55   : > { %1308 = vsyncadd (%p1851_p8), %s185_s4, 4294967168  ;;  %s1035_s5 = sshll.u32 %s1509_s15, 2  ;;  %s194_s29 = scalar_lea.sflag [#allocation7], %s1509_s15 }
  0x56   : > { %s197_s16 = scalar_lea.vmem [#allocation6], %s1035_s5 }
  0x57   : > { %1310 = dma.done.wait (%p1851_p8), %s194_s29, 64  }
  0x58   : > { %1312 = vsyncadd (%p1851_p8), %s194_s29, 4294967232  ;;  %v230_v0 = vlaneseq  ;;  %v1525_v6 = vld [vmem:[%s188_s6] sm:$0xff]  ;;  %v269_v19 = vld [vmem:[%s197_s16] sm:$0xf]  ;;  %v1343_v49 = vmov 1966171168  }
  0x59   : > { %v789_v9 = vcombine.high %v1525_v6, %v1525_v6  ;;  %v465_v50 = vunpack.c.l.s4 %v1343_v49  ;;  %s1046_s21 = sshll.u32 %s1331_s12, 7  ;;  %s222_s19 = scalar_lea.vmem [#allocation8], %s1034_s18 }
  0x5a   : > { %v231_v1 = vand.u32 127, %v230_v0  ;;  %v1529_v12 = vshrl.u32 %v230_v0, 7  ;;  %s913_s30 = sshll.u32 %s222_s19, 4  ;;  %s1788_s27 = scalar_lea.hbm %s1839_s2, %s1046_s21  ;;  %s1790_s30 = int_to_ptr.vmem [resolvable:$true] %s913_s30 }
  0x5b   : > { %855 = vmatprep.mubr.f32.mxu0 %v789_v9  ;;  %v466_v58 = vunpack.c.0.s8 %v465_v50  ;;  %s897_s28 = scalar_lea.sflag [#allocation5], %s1509_s15  ;;  %s1253_s25 = scalar_lea.vmem %s1790_s30, 128 }
  0x5c   : > { %v232_v2 = vadd.s32 128, %v231_v1  ;;  %v237_v3 = vcvt.s32.f32 %v231_v1  ;;  %v1532_v18 = vsub.s32 1, %v1529_v12  ;;  %v1535_v23 = vsub.s32 0, %v1529_v12  ;;  %p1254_p0 = scmp.ne.s32.totalorder %s1790_s30, %s1253_s25  ;;  %p1861_p5 = scmp.ne.s32.totalorder %s1844_s22, 0 }
  0x5d   : > { %v289_v25 = vsub.s32 3, %v1529_v12  ;;  %v277_v31 = vsub.s32 2, %v1529_v12  ;;  %s1345_s12 = smov [#allocation8]  }
  0x5e   : > { %v238_v4 = vcvt.s32.f32 %v232_v2  ;;  %v239_v5 = vmul.f32 0.0625, %v237_v3  ;;  %v286_v29 = vrot.slane %v269_v19, %v1532_v18  ;;  %v274_v35 = vrot.slane %v269_v19, %v1535_v23  ;;  %p1255_p7 = pnand %p1254_p0, %p1861_p5  ;;  %s1257_s3 = sshll.u32 %s1345_s12, 4  ;;  %s1258_s3 = int_to_ptr.vmem [resolvable:$false] %s1257_s3 }
  0x5f   : > { %v290_v37 = vrot.slane %v269_v19, %v289_v25  ;;  %v278_v42 = vrot.slane %v269_v19, %v277_v31  ;;  %s1259_s7 = scalar_lea.vmem %s1258_s3, 256  ;;  %p1260_p10 = scmp.lt.s32.totalorder %s1790_s30, %s1258_s3 }
  0x60   : > { %v240_v7 = vmul.f32 0.0625, %v238_v4  ;;  %v241_v8 = vfloor.f32 %v239_v5  ;;  %p1256_p4 = pneg %p1255_p7  ;;  %p1261_p12 = scmp.lt.s32.totalorder %s1259_s7, %s1253_s25 }
  0x62   : > { %v242_v10 = vfloor.f32 %v240_v7  ;;  %v1111_v11 = vtrunc.f32 %v241_v8  ;;  %p1262_p1 = por %p1261_p12, %p1260_p10 }
  0x64   : > { %v1112_v13 = vcvt.f32.s32 %v1111_v11  ;;  %v1113_v14 = vtrunc.f32 %v242_v10  ;;  %v1565_v11 = vadd.s32 8, %v1529_v12  ;;  %p1263_p2 = pnand %p1262_p1, %p1256_p4 }
  0x66   : > { %v1114_v15 = vcvt.f32.s32 %v1113_v14  ;;  %v245_v16 = vmul.u32 16, %v1112_v13  ;;  %v1037_v17 = vadd.s32 4294967295, %v1112_v13  ;;  %v251_v22 = vadd.s32 1, %v1112_v13 }
  0x68   : > { %v246_v20 = vmul.u32 16, %v1114_v15  ;;  %v247_v21 = vsub.s32 %v231_v1, %v245_v16  ;;  %v1038_v24 = vadd.s32 4294967295, %v1114_v15  ;;  %v252_v27 = vadd.s32 1, %v1114_v15 }
  0x6a   : > { %v248_v26 = vsub.s32 %v232_v2, %v246_v20  ;;  %vm249_vm0 = vcmp.ge.s32.totalorder %v247_v21, 16  ;;  %vm253_vm1 = vcmp.lt.s32.totalorder %v247_v21, 0 }
  0x6b   : > { %v257_v28 = vsel %vm253_vm1, %v1037_v17, %v1112_v13  ;;  %v1568_v13 = vsub.s32 %v466_v58, %v1529_v12 }
  0x6c   : > { %vm250_vm2 = vcmp.ge.s32.totalorder %v248_v26, 16  ;;  %vm254_vm3 = vcmp.lt.s32.totalorder %v248_v26, 0  ;;  %v259_v30 = vsel %vm249_vm0, %v251_v22, %v257_v28 }
  0x6d   : > { %v258_v32 = vsel %vm254_vm3, %v1038_v24, %v1114_v15  ;;  %v261_v33 = vmul.u32 16, %v259_v30  ;;  %v265_v34 = vcvt.s32.f32 %v259_v30 }
  0x6e   : > { %v260_v36 = vsel %vm250_vm2, %v252_v27, %v258_v32 }
  0x6f   : > { %v262_v38 = vmul.u32 16, %v260_v36  ;;  %v263_v39 = vsub.s32 %v231_v1, %v261_v33  ;;  %v266_v40 = vcvt.s32.f32 %v260_v36  ;;  %v293_v41 = vadd.f32 %v286_v29, %v265_v34 }
  0x71   : > { %v264_v43 = vsub.s32 %v232_v2, %v262_v38  ;;  %v267_v44 = vcvt.s32.f32 %v263_v39  ;;  %v294_v45 = vadd.f32 %v290_v37, %v266_v40  ;;  %v297_v48 = vfloor.f32 %v293_v41 }
  0x73   : > { %v268_v46 = vcvt.s32.f32 %v264_v43  ;;  %v281_v47 = vadd.f32 %v274_v35, %v267_v44  ;;  %v303_v53 = vsub.f32 %v293_v41, %v297_v48  ;;  %v298_v54 = vfloor.f32 %v294_v45 }
  0x74   : > { %vm319_vm4 = vcmp.ge.f32.partialorder %v297_v48, 0.0  ;;  %vm321_vm5 = vcmp.le.f32.partialorder %v297_v48, 15.0  ;;  %vm325_vm6 = vcmp.ge.f32.partialorder %v297_v48, -1.0  ;;  %vm327_vm7 = vcmp.le.f32.partialorder %v297_v48, 14.0 }
  0x75   : > { %v282_v51 = vadd.f32 %v278_v42, %v268_v46  ;;  %v295_v52 = vfloor.f32 %v281_v47  ;;  %v304_v57 = vsub.f32 %v294_v45, %v298_v54  ;;  %vm320_vm8 = vcmp.ge.f32.partialorder %v298_v54, 0.0  ;;  %vm1541_vm12 = vmand %vm319_vm4, %vm321_vm5 }
  0x76   : > { %vm322_vm9 = vcmp.le.f32.partialorder %v298_v54, 15.0  ;;  %v305_v60 = vsub.f32 1.0, %v303_v53  ;;  %vm1546_vm1 = vmand %vm325_vm6, %vm327_vm7  ;;  %v1119_v4 = vtrunc.f32 %v297_v48  ;;  %v1121_v5 = vtrunc.f32 %v298_v54 }
  0x77   : > { %v296_v55 = vfloor.f32 %v282_v51  ;;  %v299_v56 = vsub.f32 %v281_v47, %v295_v52  ;;  %vm307_vm10 = vcmp.ge.f32.partialorder %v295_v52, 0.0  ;;  %vm309_vm11 = vcmp.le.f32.partialorder %v295_v52, 15.0  ;;  %vm1552_vm4 = vmand %vm320_vm8, %vm322_vm9 }
  0x78   : > { %vm313_vm15 = vcmp.ge.f32.partialorder %v295_v52, -1.0  ;;  %vm315_vm3 = vcmp.le.f32.partialorder %v295_v52, 14.0  ;;  %v1115_v1 = vtrunc.f32 %v295_v52  ;;  %vm1556_vm5 = vmand %vm307_vm10, %vm309_vm11  ;;  %v306_v8 = vsub.f32 1.0, %v304_v57 }
  0x79   : > { %v300_v59 = vsub.f32 %v282_v51, %v296_v55  ;;  %vm308_vm13 = vcmp.ge.f32.partialorder %v296_v55, 0.0  ;;  %vm310_vm14 = vcmp.le.f32.partialorder %v296_v55, 15.0  ;;  %v301_v63 = vsub.f32 1.0, %v299_v56  ;;  %vm317_vm8 = vmand %vm313_vm15, %vm315_vm3 }
  0x7a   : > { %vm314_vm2 = vcmp.ge.f32.partialorder %v296_v55, -1.0  ;;  %vm316_vm0 = vcmp.le.f32.partialorder %v296_v55, 14.0  ;;  %v1117_v3 = vtrunc.f32 %v296_v55  ;;  %vm312_vm6 = vmand %vm308_vm13, %vm310_vm14  ;;  %vm328_vm7 = vcmp.le.f32.partialorder %v298_v54, 14.0 }
  0x7b   : > { %v302_v7 = vsub.f32 1.0, %v300_v59  ;;  %v1116_v9 = vcvt.f32.s32 %v1115_v1  ;;  %vm318_vm9 = vmand %vm314_vm2, %vm316_vm0  ;;  %vm1860_vm10 = vcmp.ge.f32.partialorder %v298_v54, -1.0  ;;  %v1573_v14 = vsel %vm1556_vm5, %v301_v63, 0.0 }
  0x7c   : > { %v1118_v10 = vcvt.f32.s32 %v1117_v3  ;;  %vm330_vm11 = vmand %vm1860_vm10, %vm328_vm7  ;;  %v1577_v15 = vsel %vm1541_vm12, %v305_v60, 0.0  ;;  %v1120_v16 = vcvt.f32.s32 %v1119_v4  ;;  %v1122_v17 = vcvt.f32.s32 %v1121_v5 }
  0x7d   : > { %v1579_v19 = vsel %vm312_vm6, %v302_v7, 0.0  ;;  %v1583_v20 = vsel %vm1552_vm4, %v306_v8, 0.0  ;;  %v341_v21 = vadd.s32 1, %v1116_v9  ;;  %v353_v22 = vrot.slane %v1116_v9, %v1535_v23 }
  0x7e   : > { %v1586_v24 = vsel %vm317_vm8, %v299_v56, 0.0  ;;  %v1588_v25 = vsel %vm318_vm9, %v300_v59, 0.0  ;;  %v342_v26 = vadd.s32 1, %v1118_v10  ;;  %v409_v27 = vrot.slane %v1120_v16, %v1535_v23 }
  0x7f   : > { %v1593_v28 = vsel %vm1546_vm1, %v303_v53, 0.0  ;;  %v1595_v29 = vsel %vm330_vm11, %v304_v57, 0.0  ;;  %v357_v30 = vrot.slane %v1118_v10, %v1535_v23  ;;  %v365_v31 = vrot.slane %v1573_v14, %v1535_v23 }
  0x80   : > { %v345_v32 = vadd.s32 1, %v1120_v16  ;;  %v346_v33 = vadd.s32 1, %v1122_v17  ;;  %v369_v34 = vrot.slane %v1579_v19, %v1535_v23  ;;  %v413_v35 = vrot.slane %v1122_v17, %v1535_v23 }
  0x81   : > { %vm358_vm12 = vcmp.eq.s32.totalorder %v1529_v12, %v353_v22  ;;  %v377_v36 = vrot.slane %v341_v21, %v1535_v23  ;;  %v389_v37 = vrot.slane %v1586_v24, %v1535_v23  ;;  %v393_v38 = vrot.slane %v1588_v25, %v1535_v23 }
  0x82   : > { %vm360_vm13 = vcmp.eq.s32.totalorder %v1565_v11, %v353_v22  ;;  %v381_v39 = vrot.slane %v342_v26, %v1535_v23  ;;  %vm414_vm14 = vcmp.eq.s32.totalorder %v1529_v12, %v409_v27  ;;  %vm415_vm15 = vcmp.eq.s32.totalorder %v1529_v12, %v413_v35 }
  0x83   : > { %vm359_vm0 = vcmp.eq.s32.totalorder %v1529_v12, %v357_v30  ;;  %vm361_vm1 = vcmp.eq.s32.totalorder %v1565_v11, %v357_v30  ;;  %v421_v40 = vrot.slane %v1577_v15, %v1535_v23  ;;  %v425_v41 = vrot.slane %v1583_v20, %v1535_v23 }
  0x84   : > { %v433_v42 = vrot.slane %v345_v32, %v1535_v23  ;;  %v437_v43 = vrot.slane %v346_v33, %v1535_v23  ;;  %v445_v44 = vrot.slane %v1593_v28, %v1535_v23  ;;  %v449_v45 = vrot.slane %v1595_v29, %v1535_v23 }
  0x85   : > { %vm382_vm2 = vcmp.eq.s32.totalorder %v1529_v12, %v377_v36  ;;  %vm384_vm3 = vcmp.eq.s32.totalorder %v1565_v11, %v377_v36  ;;  %v426_v46 = vsel %vm414_vm14, %v421_v40, 0.0  ;;  %v427_v47 = vsel %vm415_vm15, %v425_v41, 0.0 }
  0x86   : > { %vm383_vm4 = vcmp.eq.s32.totalorder %v1529_v12, %v381_v39  ;;  %vm385_vm5 = vcmp.eq.s32.totalorder %v1565_v11, %v381_v39  ;;  %vm438_vm6 = vcmp.eq.s32.totalorder %v1529_v12, %v433_v42  ;;  %vm439_vm7 = vcmp.eq.s32.totalorder %v1529_v12, %v437_v43 }
  0x87   : > { %v370_v48 = vsel %vm358_vm12, %v365_v31, 0.0  ;;  %v372_v49 = vsel %vm360_vm13, %v365_v31, 0.0  ;;  %v450_v50 = vsel %vm438_vm6, %v445_v44, 0.0  ;;  %v451_v51 = vsel %vm439_vm7, %v449_v45, 0.0 }
  0x88   : > { %v371_v52 = vsel %vm359_vm0, %v369_v34, 0.0  ;;  %v373_v53 = vsel %vm361_vm1, %v369_v34, 0.0  ;;  %v454_v54 = vadd.f32 %v450_v50, %v426_v46  ;;  %v455_v55 = vadd.f32 %v451_v51, %v427_v47 }
  0x89   : > { %v394_v56 = vsel %vm382_vm2, %v389_v37, 0.0  ;;  %v395_v57 = vsel %vm383_vm4, %v393_v38, 0.0  ;;  %v396_v58 = vsel %vm384_vm3, %v389_v37, 0.0  ;;  %v397_v59 = vsel %vm385_vm5, %v393_v38, 0.0 }
  0x8a   : > { %v462_v60 = vcombine.low %v454_v54, %v455_v55  ;;  %v463_v61 = vcombine.high %v454_v54, %v455_v55  ;;  %vm416_vm8 = vcmp.eq.s32.totalorder %v1565_v11, %v409_v27  ;;  %vm417_vm9 = vcmp.eq.s32.totalorder %v1565_v11, %v413_v35 }
  0x8b   : > { %vm440_vm10 = vcmp.eq.s32.totalorder %v1565_v11, %v433_v42  ;;  %vm441_vm11 = vcmp.eq.s32.totalorder %v1565_v11, %v437_v43  ;;  %v1647_v62 = vadd.f32 %v394_v56, %v370_v48  ;;  %v1649_v63 = vadd.f32 %v396_v58, %v372_v49 }
  0x8c   : > { %v470_v12 = vrot.slane %v462_v60, %v1568_v13  ;;  %v477_v0 = vrot.slane %v463_v61, %v1568_v13  ;;  %v1653_v1 = vadd.f32 %v395_v57, %v371_v52  ;;  %v1655_v2 = vadd.f32 %v397_v59, %v373_v53 }
  0x8d   : > { %v428_v3 = vsel %vm416_vm8, %v421_v40, 0.0  ;;  %v429_v4 = vsel %vm417_vm9, %v425_v41, 0.0  ;;  %v452_v8 = vsel %vm440_vm10, %v445_v44, 0.0  ;;  %v453_v9 = vsel %vm441_vm11, %v449_v45, 0.0 }
  0x8e   : > { %v478_v5 = vcombine.high %v470_v12, %v470_v12  ;;  %v486_v7 = vrot.slane %v470_v12, %v1568_v13  ;;  %v493_v10 = vrot.slane %v477_v0, %v1568_v13  ;;  %v479_v22 = vcombine.high %v477_v0, %v477_v0 }
  0x8f   : > { %v1662_v26 = vadd.f32 %v452_v8, %v428_v3  ;;  %v1664_v27 = vadd.f32 %v453_v9, %v429_v4 }
  0x90   : > { %v569_v11 = vrot.slane %v486_v7, %v1532_v18  ;;  %v565_v16 = vrot.slane %v486_v7, %v1535_v23  ;;  %v500_v17 = vrot.slane %v478_v5, %v1568_v13  ;;  %v508_v21 = vcombine.high %v486_v7, %v486_v7 }
  0x91   : > { %v601_v41 = vrot.slane %v493_v10, %v1532_v18  ;;  %v507_v55 = vrot.slane %v479_v22, %v1568_v13  ;;  %v597_v59 = vrot.slane %v493_v10, %v1535_v23  ;;  %v512_v60 = vcombine.low %v1662_v26, %v1664_v27 }
  0x92   : > { %v723_v30 = vmul.f32 %v569_v11, %v1653_v1  ;;  %v725_v31 = vmul.f32 %v569_v11, %v1655_v2  ;;  %v722_v32 = vmul.f32 %v565_v16, %v1647_v62  ;;  %v724_v33 = vmul.f32 %v565_v16, %v1649_v63 }
  0x93   : > { %v577_v34 = vrot.slane %v500_v17, %v1532_v18  ;;  %v573_v35 = vrot.slane %v500_v17, %v1535_v23  ;;  %v585_v36 = vrot.slane %v508_v21, %v1532_v18  ;;  %v581_v37 = vrot.slane %v508_v21, %v1535_v23 }
  0x94   : > { %v1047_v38 = vpack.c.bf16 %v725_v31, %v723_v30  ;;  %v1049_v39 = vpack.c.bf16 %v724_v33, %v722_v32  ;;  %v510_v40 = vcombine.high %v500_v17, %v500_v17  ;;  %v739_v58 = vmul.f32 %v601_v41, %v1653_v1 }
  0x95   : > { %v727_v42 = vmul.f32 %v577_v34, %v1653_v1  ;;  %v729_v43 = vmul.f32 %v577_v34, %v1655_v2  ;;  %v726_v44 = vmul.f32 %v573_v35, %v1647_v62  ;;  %v728_v45 = vmul.f32 %v573_v35, %v1649_v63 }
  0x96   : > { %1048 = vmatprep.subr.bf16.mxu0 %v1047_v38  ;;  %v731_v46 = vmul.f32 %v585_v36, %v1653_v1  ;;  %v733_v47 = vmul.f32 %v585_v36, %v1655_v2  ;;  %v730_v48 = vmul.f32 %v581_v37, %v1647_v62  ;;  %v732_v49 = vmul.f32 %v581_v37, %v1649_v63 }
  0x97   : > { %1050 = vmatpush1.bf16.msra.mxu0 %v1049_v39  ;;  %v1051_v50 = vpack.c.bf16 %v729_v43, %v727_v42  ;;  %v1053_v51 = vpack.c.bf16 %v728_v45, %v726_v44  ;;  %v593_v52 = vrot.slane %v510_v40, %v1532_v18  ;;  %v589_v53 = vrot.slane %v510_v40, %v1535_v23 }
  0x98   : > { %v1055_v54 = vpack.c.bf16 %v733_v47, %v731_v46  ;;  %v1057_v61 = vpack.c.bf16 %v732_v49, %v730_v48  ;;  %v741_v3 = vmul.f32 %v601_v41, %v1655_v2  ;;  %v609_v5 = vrot.slane %v507_v55, %v1532_v18 }
  0x99   : > { %1052 = vmatprep.subr.bf16.mxu0 %v1051_v50  ;;  %v735_v56 = vmul.f32 %v593_v52, %v1653_v1  ;;  %v737_v57 = vmul.f32 %v593_v52, %v1655_v2  ;;  %v734_v12 = vmul.f32 %v589_v53, %v1647_v62  ;;  %v736_v0 = vmul.f32 %v589_v53, %v1649_v63 }
  0x9a   : > { %v509_v7 = vcombine.high %v493_v10, %v493_v10  ;;  %v738_v8 = vmul.f32 %v597_v59, %v1647_v62  ;;  %v520_v9 = vrot.slane %v512_v60, %v1568_v13  ;;  %v1063_v16 = vpack.c.bf16 %v741_v3, %v739_v58 }
  0x9b   : > { %1054 = vmatpush1.bf16.msra.mxu0 %v1053_v51  ;;  %v1059_v4 = vpack.c.bf16 %v737_v57, %v735_v56  ;;  %v1061_v11 = vpack.c.bf16 %v736_v0, %v734_v12  ;;  %v740_v17 = vmul.f32 %v597_v59, %v1649_v63  ;;  %v605_v21 = vrot.slane %v507_v55, %v1535_v23 }
  0x9c   : > { %1056 = vmatprep.subr.bf16.mxu0 %v1055_v54  ;;  %v743_v22 = vmul.f32 %v609_v5, %v1653_v1  ;;  %v745_v30 = vmul.f32 %v609_v5, %v1655_v2  ;;  %v617_v31 = vrot.slane %v509_v7, %v1532_v18  ;;  %v511_v32 = vcombine.high %v507_v55, %v507_v55 }
  0x9d   : > { %v613_v10 = vrot.slane %v509_v7, %v1535_v23  ;;  %v536_v33 = vrot.slane %v520_v9, %v1568_v13  ;;  %v1065_v34 = vpack.c.bf16 %v740_v17, %v738_v8  ;;  %v742_v35 = vmul.f32 %v605_v21, %v1647_v62 }
  0x9e   : > { %v744_v36 = vmul.f32 %v605_v21, %v1649_v63  ;;  %v528_v37 = vcombine.high %v520_v9, %v520_v9  ;;  %v1067_v38 = vpack.c.bf16 %v745_v30, %v743_v22  ;;  %v747_v39 = vmul.f32 %v617_v31, %v1653_v1 }
  0x9f   : > { %1058 = vmatpush1.bf16.msra.mxu0 %v1057_v61  ;;  %v749_v40 = vmul.f32 %v617_v31, %v1655_v2  ;;  %v625_v41 = vrot.slane %v511_v32, %v1532_v18  ;;  %v746_v42 = vmul.f32 %v613_v10, %v1647_v62  ;;  %v748_v43 = vmul.f32 %v613_v10, %v1649_v63 }
  0xa0   : > { %1060 = vmatprep.subr.bf16.mxu0 %v1059_v4  ;;  %v1069_v44 = vpack.c.bf16 %v744_v36, %v742_v35  ;;  %v621_v45 = vrot.slane %v511_v32, %v1535_v23  ;;  %v633_v46 = vrot.slane %v536_v33, %v1532_v18  ;;  %v550_v50 = vrot.slane %v528_v37, %v1568_v13 }
  0xa1   : > { %v1071_v47 = vpack.c.bf16 %v749_v40, %v747_v39  ;;  %v751_v48 = vmul.f32 %v625_v41, %v1653_v1  ;;  %v753_v49 = vmul.f32 %v625_v41, %v1655_v2  ;;  %v1073_v51 = vpack.c.bf16 %v748_v43, %v746_v42 }
  0xa2   : > { %v629_v52 = vrot.slane %v536_v33, %v1535_v23  ;;  %v513_v53 = vcombine.high %v1662_v26, %v1664_v27  ;;  %v750_v54 = vmul.f32 %v621_v45, %v1647_v62  ;;  %v752_v55 = vmul.f32 %v621_v45, %v1649_v63 }
  0xa3   : > { %1062 = vmatpush1.bf16.msra.mxu0 %v1061_v11  ;;  %v755_v56 = vmul.f32 %v633_v46, %v1653_v1  ;;  %v757_v57 = vmul.f32 %v633_v46, %v1655_v2  ;;  %v1075_v58 = vpack.c.bf16 %v753_v49, %v751_v48  ;;  %v641_v59 = vrot.slane %v550_v50, %v1532_v18 }
  0xa4   : > { %1064 = vmatprep.subr.bf16.mxu0 %v1063_v16  ;;  %v558_v60 = vcombine.high %v536_v33, %v536_v33  ;;  %v754_v61 = vmul.f32 %v629_v52, %v1647_v62  ;;  %v527_v12 = vrot.slane %v513_v53, %v1568_v13  ;;  %v1077_v26 = vpack.c.bf16 %v752_v55, %v750_v54 }
  0xa5   : > { %v1079_v27 = vpack.c.bf16 %v757_v57, %v755_v56  ;;  %v756_v0 = vmul.f32 %v629_v52, %v1649_v63  ;;  %v637_v3 = vrot.slane %v550_v50, %v1535_v23  ;;  %v759_v4 = vmul.f32 %v641_v59, %v1653_v1 }
  0xa6   : > { %v761_v5 = vmul.f32 %v641_v59, %v1655_v2  ;;  %v649_v7 = vrot.slane %v558_v60, %v1532_v18  ;;  %v560_v8 = vcombine.high %v550_v50, %v550_v50  ;;  %v543_v9 = vrot.slane %v527_v12, %v1568_v13 }
  0xa7   : > { %1066 = vmatpush1.bf16.msra.mxu0 %v1065_v34  ;;  %v529_v11 = vcombine.high %v527_v12, %v527_v12  ;;  %v1081_v16 = vpack.c.bf16 %v756_v0, %v754_v61  ;;  %v758_v17 = vmul.f32 %v637_v3, %v1647_v62  ;;  %v760_v21 = vmul.f32 %v637_v3, %v1649_v63 }
  0xa8   : > { %1068 = vmatprep.subr.bf16.mxu0 %v1067_v38  ;;  %v645_v22 = vrot.slane %v558_v60, %v1535_v23  ;;  %v1083_v30 = vpack.c.bf16 %v761_v5, %v759_v4  ;;  %v763_v31 = vmul.f32 %v649_v7, %v1653_v1  ;;  %v765_v32 = vmul.f32 %v649_v7, %v1655_v2 }
  0xa9   : > { %v657_v10 = vrot.slane %v560_v8, %v1532_v18  ;;  %v665_v33 = vrot.slane %v543_v9, %v1532_v18  ;;  %v1085_v34 = vpack.c.bf16 %v760_v21, %v758_v17  ;;  %v653_v37 = vrot.slane %v560_v8, %v1535_v23 }
  0xaa   : > { %v762_v35 = vmul.f32 %v645_v22, %v1647_v62  ;;  %v764_v36 = vmul.f32 %v645_v22, %v1649_v63  ;;  %v1087_v38 = vpack.c.bf16 %v765_v32, %v763_v31  ;;  %v557_v41 = vrot.slane %v529_v11, %v1568_v13 }
  0xab   : > { %1070 = vmatpush1.bf16.msra.mxu0 %v1069_v44  ;;  %v767_v39 = vmul.f32 %v657_v10, %v1653_v1  ;;  %v769_v40 = vmul.f32 %v657_v10, %v1655_v2  ;;  %v771_v42 = vmul.f32 %v665_v33, %v1653_v1  ;;  %v773_v43 = vmul.f32 %v665_v33, %v1655_v2 }
  0xac   : > { %1072 = vmatprep.subr.bf16.mxu0 %v1071_v47  ;;  %v1089_v44 = vpack.c.bf16 %v764_v36, %v762_v35  ;;  %v766_v45 = vmul.f32 %v653_v37, %v1647_v62  ;;  %v768_v46 = vmul.f32 %v653_v37, %v1649_v63  ;;  %v661_v47 = vrot.slane %v543_v9, %v1535_v23 }
  0xad   : > { %v1091_v48 = vpack.c.bf16 %v769_v40, %v767_v39  ;;  %v673_v49 = vrot.slane %v557_v41, %v1532_v18  ;;  %v559_v50 = vcombine.high %v543_v9, %v543_v9  ;;  %v669_v54 = vrot.slane %v557_v41, %v1535_v23 }
  0xae   : > { %v1093_v13 = vpack.c.bf16 %v768_v46, %v766_v45  ;;  %v770_v52 = vmul.f32 %v661_v47, %v1647_v62  ;;  %v772_v53 = vmul.f32 %v661_v47, %v1649_v63  ;;  %v871_v31 = vadd.f32 %v1586_v24, %v1573_v14 }
  0xaf   : > { %1074 = vmatpush1.bf16.msra.mxu0 %v1073_v51  ;;  %v1095_v51 = vpack.c.bf16 %v773_v43, %v771_v42  ;;  %v775_v55 = vmul.f32 %v673_v49, %v1653_v1  ;;  %v777_v56 = vmul.f32 %v673_v49, %v1655_v2  ;;  %v681_v57 = vrot.slane %v559_v50, %v1532_v18 }
  0xb0   : > { %1076 = vmatprep.subr.bf16.mxu0 %v1075_v58  ;;  %v561_v58 = vcombine.high %v557_v41, %v557_v41  ;;  %v1097_v59 = vpack.c.bf16 %v772_v53, %v770_v52  ;;  %v774_v60 = vmul.f32 %v669_v54, %v1647_v62  ;;  %v776_v61 = vmul.f32 %v669_v54, %v1649_v63 }
  0xb1   : > { %v677_v12 = vrot.slane %v559_v50, %v1535_v23  ;;  %v781_v0 = vmul.f32 %v681_v57, %v1655_v2  ;;  %v1344_v10 = vmov 1.0  }
  0xb2   : > { %v689_v3 = vrot.slane %v561_v58, %v1532_v18  ;;  %v1101_v4 = vpack.c.bf16 %v776_v61, %v774_v60  ;;  %v685_v8 = vrot.slane %v561_v58, %v1535_v23 }
  0xb3   : > { %1078 = vmatpush1.bf16.msra.mxu0 %v1077_v26  ;;  %v1099_v26 = vpack.c.bf16 %v777_v56, %v775_v55  ;;  %v778_v5 = vmul.f32 %v677_v12, %v1647_v62  ;;  %v780_v7 = vmul.f32 %v677_v12, %v1649_v63 }
  0xb4   : > { %1080 = vmatprep.subr.bf16.mxu0 %v1079_v27  ;;  %v779_v27 = vmul.f32 %v681_v57, %v1653_v1  ;;  %v783_v11 = vmul.f32 %v689_v3, %v1653_v1  ;;  %v782_v21 = vmul.f32 %v685_v8, %v1647_v62  ;;  %v784_v18 = vmul.f32 %v685_v8, %v1649_v63 }
  0xb5   : > { %v1105_v17 = vpack.c.bf16 %v780_v7, %v778_v5  ;;  %v872_v1 = vadd.f32 %v1588_v25, %v1579_v19  ;;  %v873_v62 = vadd.f32 %v1593_v28, %v1577_v15  ;;  %v874_v63 = vadd.f32 %v1595_v29, %v1583_v20 }
  0xb6   : > { %v1103_v9 = vpack.c.bf16 %v781_v0, %v779_v27 }
  0xb7   : > { %1082 = vmatpush1.bf16.msra.mxu0 %v1081_v16  ;;  %v785_v16 = vmul.f32 %v689_v3, %v1655_v2  ;;  %v875_v2 = vmul.f32 %v873_v62, %v871_v31  ;;  %v876_v32 = vmul.f32 %v874_v63, %v872_v1 }
  0xb8   : > { %1084 = vmatprep.subr.bf16.mxu0 %v1083_v30  ;;  %v1109_v30 = vpack.c.bf16 %v784_v18, %v782_v21 }
  0xb9   : > { %v1107_v22 = vpack.c.bf16 %v785_v16, %v783_v11  ;;  %vm877_vm12 = vcmp.lt.f32.partialorder %v875_v2, 0.9999  ;;  %vm878_vm13 = vcmp.lt.f32.partialorder %v876_v32, 0.9999 }
  0xba   : > { %v880_v33 = vsel %vm878_vm13, 0.0, %v1344_v10 }
  0xbb   : > { %1086 = vmatpush1.bf16.msra.mxu0 %v1085_v34  ;;  %v889_v19 = vrot.slane %v880_v33, %v1535_v23 }
  0xbc   : > { %1088 = vmatprep.subr.bf16.mxu0 %v1087_v38 }
  0xbf   : > { %1090 = vmatpush1.bf16.msra.mxu0 %v1089_v44 }
  0xc0   : > { %1092 = vmatprep.subr.bf16.mxu0 %v1091_v48 }
  0xc3   : > { %1094 = vmatpush1.bf16.msra.mxu0 %v1093_v13 }
  0xc4   : > { %1096 = vmatprep.subr.bf16.mxu0 %v1095_v51 }
  0xc7   : > { %1098 = vmatpush1.bf16.msra.mxu0 %v1097_v59 }
  0xc8   : > { %1100 = vmatprep.subr.bf16.mxu0 %v1099_v26 }
  0xcb   : > { %1102 = vmatpush1.bf16.msra.mxu0 %v1101_v4 }
  0xcc   : > { %1104 = vmatprep.subr.bf16.mxu0 %v1103_v9 }
  0xcf   : > { %1106 = vmatpush1.bf16.msra.mxu0 %v1105_v17 }
  0xd0   : > { %1108 = vmatprep.subr.bf16.mxu0 %v1107_v22 }
  0xd3   : > { %1110 = vmatpush1.bf16.msra.mxu0 %v1109_v30 }
  0xd6   : > { %856 = vmatmul.mubr.f32.vlgmr.msra.gmra.mrb[0].mxu0 %v1525_v6  ;;  %v879_v6 = vsel %vm877_vm12, 0.0, %v1344_v10 }
  0xd7   : > { %v885_v14 = vrot.slane %v879_v6, %v1535_v23 }
  0xd9   : > { %v892_v25 = vcombine.low %v885_v14, %v889_v19 }
 0x1a9   : > { %v857_v24 = vpop.f32.mrb[0].mxu0 }
 0x1aa   : > { %v859_v34 = vpop.f32.mrb[1].mxu0 }
 0x1ab   : > { %v864_v15 = vcombine.low %v857_v24, %v859_v34 }
 0x1ad   : > { %v894_v20 = vmul.f32 %v892_v25, %v864_v15 }
 0x1af   : > { %895 = vst [vmem:[%s222_s19] sm:$0xff] %v894_v20 }
 0x1b0   : > { %1266 = shalt.err (!%p1263_p2)
}
 0x1b1   : > { %s1267_s8 = scalar_lea.hbm %s1788_s27, 128  ;;  %s1271_s4 = scalar_lea.hbm %s1839_s2, 256 }
 0x1b2   : > { %p1268_p9 = scmp.ne.s32.totalorder %s1788_s27, %s1267_s8  ;;  %p1272_p6 = scmp.lt.u32.totalorder %s1788_s27, %s1839_s2 }
 0x1b3   : > { %p1273_p13 = scmp.lt.u32.totalorder %s1271_s4, %s1267_s8  ;;  %p1275_p0 = scmp.lt.u32.totalorder %s1267_s8, %s1788_s27 }
 0x1b4   : > { %p1269_p11 = pnand %p1268_p9, %p1861_p5 }
 0x1b5   : > { %p1274_p8 = por %p1273_p13, %p1272_p6 }
 0x1b6   : > { %p1270_p3 = pneg %p1269_p11 }
 0x1b7   : > { %p1276_p7 = por %p1275_p0, %p1274_p8 }
 0x1b9   : > { %p1277_p4 = pnand %p1276_p7, %p1270_p3 }
 0x1bb   : > { %1280 = shalt.err (!%p1277_p4)
}
 0x1bc   : > { %1127 = dma.vmem_to_hbm [thread:$0]  (%p1861_p5), %s1790_s30, 128, %s1788_s27, %s897_s28  }
 0x1bd PF: > { %s925_s29 = sand.u32 1, %s1319_s9   ;;  %p1862_p10 = scmp.ne.s32.totalorder %s1845_s24, 0 }
 0x1be   : > { %p1863_p12 = scmp.ge.s32.totalorder %s1339_s14, 2  ;;  %s926_s16 = scalar_lea.sflag [#allocation5], %s925_s29 }
 0x1c0   : > { %p1137_p1 = pnand %p1863_p12, %p1862_p10 }
 0x1c2   : > { %1314 = dma.done.wait (!%p1137_p1), %s926_s16, 128  }
 0x1c3   : > { %1316 = vsyncadd (!%p1137_p1), %s926_s16, 4294967168  ;;  %s21_s14 = sadd.s32 1, %s1339_s14   ;;  %s1864_s9 = smov %s1323_s10 }
 0x1c4   : > { %p18_p2 = scmp.ge.s32.totalorder %s21_s14, 4   ;;  %s1865_s10 = smov %s1327_s11 }
 0x1c5   : > { %s1866_s11 = smov %s1417_s23  ;;  %s1867_s12 = smov %s1335_s13 }
 0x1c6   : > { %s1868_s13 = smov %s1870_s17  ;;  %20 = sbr.rel (!%p18_p2) target bundleno = 8 (0x8), region = 94 }
 0x1cd   :  { %931 = vsyncpa [#allocation4], 1 }
 0x1ce   :  { %933 = vsyncpa [#allocation4 + $0x1], 1 }
 0x1cf   :  { %934 = vsyncpa [#allocation7], 1 }
 0x1d0   :  { %936 = vsyncpa [#allocation7 + $0x1], 1 }
 0x1d1   :  { %937 = vsyncpa [#allocation5], 1 }
 0x1d2   :  { %939 = vsyncpa [#allocation5 + $0x1], 1 }

</bundles_post_ra>
